<compile_context>
chip_gen: v7x
topology: tpu7x:2x2x1
jax: 0.10.0
libtpu: 0.0.40
codegen_flags: <defaults>
</compile_context>

<pallas_src>
import functools

import numpy as np
import jax
import jax.numpy as jnp
from jax.experimental import pallas as pl
from jax.experimental.pallas import tpu as pltpu


def _round_up(n, m):
    return ((n + m - 1) // m) * m


def _csvae_kernel(
    # ---- data inputs (per-batch-tile blocks) ----
    xy_ref, ximm_ref, eps_ref,
    # ---- parameters (resident; weights bf16, biases f32) ----
    exz_w1, exz_b1, exz_wh, exz_bh,          # encoder x -> z          (heads fused mu||lv)
    exyw_w1, exyw_b1, exyw_wh, exyw_bh,      # encoder (x,y) -> w
    eyw_w1, eyw_b1, eyw_wh, eyw_bh,          # encoder y -> w (prior)
    dzw_w1, dzw_b1, dzw_wh, dzw_bh,          # decoder (z,x_imm,w) -> x
    dzy_w1, dzy_b1, dzy_w2, dzy_b2,          # decoder (z,x_imm) -> y
    # ---- single lane-packed output slab ----
    out_ref,
    *, n_mut, n_imm, z_dim, w_dim,
):
    f32 = jnp.float32
    bf16 = jnp.bfloat16

    def dot(a, w_ref):
        # bf16 MXU operands, f32 accumulation.
        return jnp.dot(a.astype(bf16), w_ref[...], preferred_element_type=f32)

    xy = xy_ref[...]                       # (TB, n_mut + labels_dim), f32
    x_mut = xy[:, :n_mut]
    y = xy[:, n_mut:]
    x_imm = ximm_ref[...]                  # (TB, n_imm)
    eps = eps_ref[...]                     # (TB, z_dim + w_dim)
    eps_z = eps[:, :z_dim]
    eps_w = eps[:, z_dim:]

    # ---- q(z | x_mutable): trunk + fused mu/logvar head ----
    h_xz = jnp.maximum(dot(x_mut, exz_w1) + exz_b1[...], 0.0)
    z_heads = dot(h_xz, exz_wh) + exz_bh[...]
    z_mu, z_lv = z_heads[:, :z_dim], z_heads[:, z_dim:]

    # ---- q(w | x_mutable, y): cat([x,y]) already fused in the wrapper ----
    h_xyw = jnp.maximum(dot(xy, exyw_w1) + exyw_b1[...], 0.0)
    we_heads = dot(h_xyw, exyw_wh) + exyw_bh[...]
    w_mu_e, w_lv_e = we_heads[:, :w_dim], we_heads[:, w_dim:]

    # ---- prior p(w | y) ----
    h_yw = jnp.maximum(dot(y, eyw_w1) + eyw_b1[...], 0.0)
    wp_heads = dot(h_yw, eyw_wh) + eyw_bh[...]
    w_mu_p, w_lv_p = wp_heads[:, :w_dim], wp_heads[:, w_dim:]

    # ---- reparameterize (eps supplied from outside, f32 math) ----
    w_enc = w_mu_e + eps_w * jnp.exp(0.5 * w_lv_e)
    z_s = z_mu + eps_z * jnp.exp(0.5 * z_lv)

    # ---- zw = cat([z_sample, x_immutable, w_encoder]) (torch semantics) ----
    ziw = jnp.concatenate([z_s, x_imm, w_enc], axis=1)

    # ---- p(x | z, x_immutable, w): single fused dot on the concat ----
    h_dec = jnp.maximum(dot(ziw, dzw_w1) + dzw_b1[...], 0.0)
    x_heads = dot(h_dec, dzw_wh) + dzw_bh[...]
    x_mu, x_lv = x_heads[:, :n_mut], x_heads[:, n_mut:]

    # ---- decoder (z, x_immutable) -> y_pred (sigmoid head) ----
    zi = ziw[:, :z_dim + n_imm]
    h_zy = jnp.maximum(dot(zi, dzy_w1) + dzy_b1[...], 0.0)
    logits = dot(h_zy, dzy_w2) + dzy_b2[...]
    # sigmoid = 1 / (1 + exp(-x)); exp and reciprocal both issue on the EUP.
    y_pred = pl.reciprocal(1.0 + jnp.exp(-logits), approx=True)

    # ---- one lane-dense store of every output ----
    out_ref[...] = jnp.concatenate(
        [x_mu, x_lv, ziw, y_pred, w_mu_e, w_lv_e, w_mu_p, w_lv_p, z_mu, z_lv],
        axis=1)


def _pack_params(params):
    """Fuse mu/logvar head pairs column-wise; cast matmul weights to bf16."""
    bf16, f32 = jnp.bfloat16, jnp.float32

    def heads(prefix):
        wh = jnp.concatenate(
            [params[prefix + "_wmu"], params[prefix + "_wlv"]], axis=1).astype(bf16)
        bh = jnp.concatenate(
            [params[prefix + "_bmu"], params[prefix + "_blv"]], axis=1).astype(f32)
        return wh, bh

    packed = []
    for prefix in ("exz", "exyw", "eyw", "dzw"):
        wh, bh = heads(prefix)
        packed += [params[prefix + "_w1"].astype(bf16),
                   params[prefix + "_b1"].astype(f32), wh, bh]
    packed += [params["dzy_w1"].astype(bf16), params["dzy_b1"].astype(f32),
               params["dzy_w2"].astype(bf16), params["dzy_b2"].astype(f32)]
    return packed


def csvae_forward(x, y, eps_z, eps_w, params, mutable_mask, *, block_b=256):
    """Pallas implementation of CSVAE.forward (eps passed explicitly)."""
    mutable_mask = np.asarray(mutable_mask, dtype=bool)
    mut_idx = np.where(mutable_mask)[0]
    imm_idx = np.where(~mutable_mask)[0]
    perm = np.concatenate([mut_idx, imm_idx])     # static permutation
    inv_perm = np.argsort(perm)

    B = x.shape[0]
    n_mut = len(mut_idx)
    n_imm = len(imm_idx)
    z_dim = params["exz_wmu"].shape[1]
    w_dim = params["exyw_wmu"].shape[1]
    labels_dim = params["dzy_w2"].shape[1]        # NOT assumed == w_dim
    zw_dim = z_dim + n_imm + w_dim

    x = x.astype(jnp.float32)
    y = y.astype(jnp.float32)

    # Single permutation gather, then contiguous slices.
    x_perm = x[:, perm]
    x_mut = x_perm[:, :n_mut]
    x_imm = x_perm[:, n_mut:]
    xy = jnp.concatenate([x_mut, y], axis=1)                       # fused cat([x,y])
    eps = jnp.concatenate([eps_z, eps_w], axis=1).astype(jnp.float32)

    # Batch tiling: TB multiple of 8 sublanes; pad batch to a whole tile count.
    tb = min(block_b, _round_up(B, 8))
    b_pad = _round_up(B, tb)

    def pad_b(a):
        return a if b_pad == B else jnp.pad(a, ((0, b_pad - B), (0, 0)))

    xy_p, ximm_p, eps_p = pad_b(xy), pad_b(x_imm), pad_b(eps)

    packed = _pack_params(params)

    total_cols = 2 * n_mut + zw_dim + labels_dim + 4 * w_dim + 2 * z_dim

    def batch_spec(feat):
        return pl.BlockSpec((tb, feat), lambda i: (i, 0))

    def resident_spec(a):
        return pl.BlockSpec(a.shape, lambda i: (0, 0))

    in_specs = ([batch_spec(xy.shape[1]), batch_spec(n_imm), batch_spec(eps.shape[1])]
                + [resident_spec(p) for p in packed])

    kernel = functools.partial(
        _csvae_kernel, n_mut=n_mut, n_imm=n_imm, z_dim=z_dim, w_dim=w_dim)

    slab = pl.pallas_call(
        kernel,
        out_shape=jax.ShapeDtypeStruct((b_pad, total_cols), jnp.float32),
        grid_spec=pltpu.PrefetchScalarGridSpec(
            num_scalar_prefetch=0,
            grid=(b_pad // tb,),
            in_specs=in_specs,
            out_specs=batch_spec(total_cols)),
        compiler_params=pltpu.CompilerParams(
            dimension_semantics=("parallel",)),
    )(xy_p, ximm_p, eps_p, *packed)

    slab = slab[:B]

    # Slice the lane-packed output slab back into the 10 torch outputs.
    offs = np.cumsum([0, n_mut, n_mut, zw_dim, labels_dim,
                      w_dim, w_dim, w_dim, w_dim, z_dim, z_dim])
    (x_mu_mut, x_lv_mut, zw, y_pred,
     w_mu_e, w_lv_e, w_mu_p, w_lv_p, z_mu, z_lv) = [
        slab[:, offs[i]:offs[i + 1]] for i in range(10)]

    # x[:, mutable_mask] = x_mu ; x_logvar = ones_like(x) with mutable cols set.
    # One inverse-permutation gather instead of boolean-mask scatters.
    x_mu_full = jnp.concatenate([x_mu_mut, x_imm], axis=1)[:, inv_perm]
    x_lv_full = jnp.concatenate(
        [x_lv_mut, jnp.ones((B, n_imm), jnp.float32)], axis=1)[:, inv_perm]

    return (x_mu_full, x_lv_full, zw, y_pred,
            w_mu_e, w_lv_e, w_mu_p, w_lv_p, z_mu, z_lv)


if __name__ == "__main__":
    key = jax.random.PRNGKey(0)

    # Module config: layers = [n_mutable, hidden, z_dim]; labels_dim = w_dim = 2.
    layers = [8, 16, 4]
    labels_dim = 2
    w_dim = 2
    B = 2

    # 10 total input features, 2 of them immutable (positions 3 and 7).
    mutable_mask = np.ones(10, dtype=bool)
    mutable_mask[[3, 7]] = False
    n_mut = int(mutable_mask.sum())          # == layers[0] == 8
    n_imm = int((~mutable_mask).sum())       # == 2
    D = mutable_mask.size                    # == 10
    hidden = layers[1]
    z_dim = layers[-1]
    assert n_mut == layers[0]

    keys = iter(jax.random.split(key, 64))

    def lin(fan_in, fan_out):
        # Deterministic PyTorch-style Linear init: W stored as (in, out) = weight.T.
        k1, k2 = jax.random.split(next(keys))
        bound = 1.0 / np.sqrt(fan_in)
        w = jax.random.uniform(k1, (fan_in, fan_out), jnp.float32, -bound, bound)
        b = jax.random.uniform(k2, (1, fan_out), jnp.float32, -bound, bound)
        return w, b

    params = {}
    # encoder x -> z (shared trunk + mu/logvar heads)
    params["exz_w1"], params["exz_b1"] = lin(n_mut, hidden)
    params["exz_wmu"], params["exz_bmu"] = lin(hidden, z_dim)
    params["exz_wlv"], params["exz_blv"] = lin(hidden, z_dim)
    # encoder (x, y) -> w  (first Linear takes the concatenated input, as in torch)
    params["exyw_w1"], params["exyw_b1"] = lin(n_mut + labels_dim, hidden)
    params["exyw_wmu"], params["exyw_bmu"] = lin(hidden, w_dim)
    params["exyw_wlv"], params["exyw_blv"] = lin(hidden, w_dim)
    # encoder y -> w
    params["eyw_w1"], params["eyw_b1"] = lin(labels_dim, hidden)
    params["eyw_wmu"], params["eyw_bmu"] = lin(hidden, w_dim)
    params["eyw_wlv"], params["eyw_blv"] = lin(hidden, w_dim)
    # decoder (z, x_immutable, w) -> x
    params["dzw_w1"], params["dzw_b1"] = lin(z_dim + n_imm + w_dim, hidden)
    params["dzw_wmu"], params["dzw_bmu"] = lin(hidden, n_mut)
    params["dzw_wlv"], params["dzw_blv"] = lin(hidden, n_mut)
    # decoder (z, x_immutable) -> y
    params["dzy_w1"], params["dzy_b1"] = lin(z_dim + n_imm, hidden)
    params["dzy_w2"], params["dzy_b2"] = lin(hidden, labels_dim)

    # Deterministic example inputs.
    kx, ky, kez, kew = jax.random.split(next(keys), 4)
    x = jax.random.normal(kx, (B, D), jnp.float32)
    p1 = jax.nn.sigmoid(jax.random.normal(ky, (B, 1), jnp.float32))
    y = jnp.concatenate([1.0 - p1, p1], axis=1)               # (B, 2) class probs
    eps_z = jax.random.normal(kez, (B, z_dim), jnp.float32)   # reparam noise for z
    eps_w = jax.random.normal(kew, (B, w_dim), jnp.float32)   # reparam noise for w

    outs = csvae_forward(x, y, eps_z, eps_w, params, mutable_mask)
    jax.block_until_ready(outs)

    # Shape sanity checks mirroring the torch forward return signature.
    (x_mu, x_logvar, zw, y_pred, w_mu_e, w_lv_e, w_mu_p, w_lv_p, z_mu, z_lv) = outs
    assert x_mu.shape == (B, D) and x_logvar.shape == (B, D)
    assert zw.shape == (B, z_dim + n_imm + w_dim)
    assert y_pred.shape == (B, labels_dim)
    assert z_mu.shape == (B, z_dim) and w_mu_e.shape == (B, w_dim)
    assert w_mu_p.shape == (B, w_dim) and w_lv_p.shape == (B, w_dim)
    assert bool(jnp.all(jnp.isfinite(jnp.concatenate([x_mu, x_logvar, zw, y_pred], axis=1))))
    # immutable columns of x_mu must pass through unchanged
    assert bool(jnp.allclose(x_mu[:, [3, 7]], x[:, [3, 7]]))
    assert bool(jnp.allclose(x_logvar[:, [3, 7]], 1.0))

    print("KERNEL_OK")
</pallas_src>

<mosaic_0001>
module attributes {stable_mosaic.version = 11 : i64} {
  func.func @_csvae_kernel(%arg0: i32, %arg1: memref<8x10xf32, #tpu.memory_space<vmem>>, %arg2: memref<8x2xf32, #tpu.memory_space<vmem>>, %arg3: memref<8x6xf32, #tpu.memory_space<vmem>>, %arg4: memref<8x16xbf16, #tpu.memory_space<vmem>>, %arg5: memref<1x16xf32, #tpu.memory_space<vmem>>, %arg6: memref<16x8xbf16, #tpu.memory_space<vmem>>, %arg7: memref<1x8xf32, #tpu.memory_space<vmem>>, %arg8: memref<10x16xbf16, #tpu.memory_space<vmem>>, %arg9: memref<1x16xf32, #tpu.memory_space<vmem>>, %arg10: memref<16x4xbf16, #tpu.memory_space<vmem>>, %arg11: memref<1x4xf32, #tpu.memory_space<vmem>>, %arg12: memref<2x16xbf16, #tpu.memory_space<vmem>>, %arg13: memref<1x16xf32, #tpu.memory_space<vmem>>, %arg14: memref<16x4xbf16, #tpu.memory_space<vmem>>, %arg15: memref<1x4xf32, #tpu.memory_space<vmem>>, %arg16: memref<8x16xbf16, #tpu.memory_space<vmem>>, %arg17: memref<1x16xf32, #tpu.memory_space<vmem>>, %arg18: memref<16x16xbf16, #tpu.memory_space<vmem>>, %arg19: memref<1x16xf32, #tpu.memory_space<vmem>>, %arg20: memref<6x16xbf16, #tpu.memory_space<vmem>>, %arg21: memref<1x16xf32, #tpu.memory_space<vmem>>, %arg22: memref<16x2xbf16, #tpu.memory_space<vmem>>, %arg23: memref<1x2xf32, #tpu.memory_space<vmem>>, %arg24: memref<8x42xf32, #tpu.memory_space<vmem>>) attributes {dimension_semantics = [#tpu.dimension_semantics<parallel>], iteration_bounds = array<i64: 1>, scalar_prefetch = 0 : i64, scratch_operands = 0 : i64, tpu.core_type = #tpu.core_type<tc>, window_params = [{transform_indices = @transform_0, window_bounds = array<i64: 8, 10>}, {transform_indices = @transform_1, window_bounds = array<i64: 8, 2>}, {transform_indices = @transform_2, window_bounds = array<i64: 8, 6>}, {pipeline_mode = #tpu.pipeline_mode<synchronous>, transform_indices = @transform_3, window_bounds = array<i64: 8, 16>}, {pipeline_mode = #tpu.pipeline_mode<synchronous>, transform_indices = @transform_4, window_bounds = array<i64: 1, 16>}, {pipeline_mode = #tpu.pipeline_mode<synchronous>, transform_indices = @transform_5, window_bounds = array<i64: 16, 8>}, {pipeline_mode = #tpu.pipeline_mode<synchronous>, transform_indices = @transform_6, window_bounds = array<i64: 1, 8>}, {pipeline_mode = #tpu.pipeline_mode<synchronous>, transform_indices = @transform_7, window_bounds = array<i64: 10, 16>}, {pipeline_mode = #tpu.pipeline_mode<synchronous>, transform_indices = @transform_8, window_bounds = array<i64: 1, 16>}, {pipeline_mode = #tpu.pipeline_mode<synchronous>, transform_indices = @transform_9, window_bounds = array<i64: 16, 4>}, {pipeline_mode = #tpu.pipeline_mode<synchronous>, transform_indices = @transform_10, window_bounds = array<i64: 1, 4>}, {pipeline_mode = #tpu.pipeline_mode<synchronous>, transform_indices = @transform_11, window_bounds = array<i64: 2, 16>}, {pipeline_mode = #tpu.pipeline_mode<synchronous>, transform_indices = @transform_12, window_bounds = array<i64: 1, 16>}, {pipeline_mode = #tpu.pipeline_mode<synchronous>, transform_indices = @transform_13, window_bounds = array<i64: 16, 4>}, {pipeline_mode = #tpu.pipeline_mode<synchronous>, transform_indices = @transform_14, window_bounds = array<i64: 1, 4>}, {pipeline_mode = #tpu.pipeline_mode<synchronous>, transform_indices = @transform_15, window_bounds = array<i64: 8, 16>}, {pipeline_mode = #tpu.pipeline_mode<synchronous>, transform_indices = @transform_16, window_bounds = array<i64: 1, 16>}, {pipeline_mode = #tpu.pipeline_mode<synchronous>, transform_indices = @transform_17, window_bounds = array<i64: 16, 16>}, {pipeline_mode = #tpu.pipeline_mode<synchronous>, transform_indices = @transform_18, window_bounds = array<i64: 1, 16>}, {pipeline_mode = #tpu.pipeline_mode<synchronous>, transform_indices = @transform_19, window_bounds = array<i64: 6, 16>}, {pipeline_mode = #tpu.pipeline_mode<synchronous>, transform_indices = @transform_20, window_bounds = array<i64: 1, 16>}, {pipeline_mode = #tpu.pipeline_mode<synchronous>, transform_indices = @transform_21, window_bounds = array<i64: 16, 2>}, {pipeline_mode = #tpu.pipeline_mode<synchronous>, transform_indices = @transform_22, window_bounds = array<i64: 1, 2>}, {transform_indices = @transform_23, window_bounds = array<i64: 8, 42>}]} {
    %c0 = arith.constant 0 : index
    %c0_0 = arith.constant 0 : index
    %0 = vector.load %arg1[%c0, %c0_0] : memref<8x10xf32, #tpu.memory_space<vmem>>, vector<8x10xf32>
    %1 = vector.extract_strided_slice %0 {offsets = [0, 0], sizes = [8, 8], strides = [1, 1]} : vector<8x10xf32> to vector<8x8xf32>
    %2 = vector.extract_strided_slice %0 {offsets = [0, 8], sizes = [8, 2], strides = [1, 1]} : vector<8x10xf32> to vector<8x2xf32>
    %c0_1 = arith.constant 0 : index
    %c0_2 = arith.constant 0 : index
    %3 = vector.load %arg2[%c0_1, %c0_2] : memref<8x2xf32, #tpu.memory_space<vmem>>, vector<8x2xf32>
    %c0_3 = arith.constant 0 : index
    %c0_4 = arith.constant 0 : index
    %4 = vector.load %arg3[%c0_3, %c0_4] : memref<8x6xf32, #tpu.memory_space<vmem>>, vector<8x6xf32>
    %5 = vector.extract_strided_slice %4 {offsets = [0, 0], sizes = [8, 4], strides = [1, 1]} : vector<8x6xf32> to vector<8x4xf32>
    %6 = vector.extract_strided_slice %4 {offsets = [0, 4], sizes = [8, 2], strides = [1, 1]} : vector<8x6xf32> to vector<8x2xf32>
    %7 = arith.truncf %1 : vector<8x8xf32> to vector<8x8xbf16>
    %c0_5 = arith.constant 0 : index
    %c0_6 = arith.constant 0 : index
    %8 = vector.load %arg4[%c0_5, %c0_6] : memref<8x16xbf16, #tpu.memory_space<vmem>>, vector<8x16xbf16>
    %cst = arith.constant dense<0.000000e+00> : vector<8x16xf32>
    %9 = tpu.matmul %7, %8, %cst {dimension_numbers = #tpu.dot_dimension_numbers<[1], [0], [0], [1], [0, 0, 1, 1], [], []>} : vector<8x8xbf16>, vector<8x16xbf16>, vector<8x16xf32> -> vector<8x16xf32>
    %c0_7 = arith.constant 0 : index
    %c0_8 = arith.constant 0 : index
    %10 = vector.load %arg5[%c0_7, %c0_8] : memref<1x16xf32, #tpu.memory_space<vmem>>, vector<1x16xf32>
    %11 = vector.broadcast %10 : vector<1x16xf32> to vector<8x16xf32>
    %12 = arith.addf %9, %11 : vector<8x16xf32>
    %cst_9 = arith.constant 0.000000e+00 : f32
    %13 = vector.broadcast %cst_9 : f32 to vector<8x16xf32>
    %14 = arith.maximumf %12, %13 : vector<8x16xf32>
    %15 = arith.truncf %14 : vector<8x16xf32> to vector<8x16xbf16>
    %c0_10 = arith.constant 0 : index
    %c0_11 = arith.constant 0 : index
    %16 = vector.load %arg6[%c0_10, %c0_11] : memref<16x8xbf16, #tpu.memory_space<vmem>>, vector<16x8xbf16>
    %cst_12 = arith.constant dense<0.000000e+00> : vector<8x8xf32>
    %17 = tpu.matmul %15, %16, %cst_12 {dimension_numbers = #tpu.dot_dimension_numbers<[1], [0], [0], [1], [0, 0, 1, 1], [], []>} : vector<8x16xbf16>, vector<16x8xbf16>, vector<8x8xf32> -> vector<8x8xf32>
    %c0_13 = arith.constant 0 : index
    %c0_14 = arith.constant 0 : index
    %18 = vector.load %arg7[%c0_13, %c0_14] : memref<1x8xf32, #tpu.memory_space<vmem>>, vector<1x8xf32>
    %19 = vector.broadcast %18 : vector<1x8xf32> to vector<8x8xf32>
    %20 = arith.addf %17, %19 : vector<8x8xf32>
    %21 = vector.extract_strided_slice %20 {offsets = [0, 0], sizes = [8, 4], strides = [1, 1]} : vector<8x8xf32> to vector<8x4xf32>
    %22 = vector.extract_strided_slice %20 {offsets = [0, 4], sizes = [8, 4], strides = [1, 1]} : vector<8x8xf32> to vector<8x4xf32>
    %23 = arith.truncf %0 : vector<8x10xf32> to vector<8x10xbf16>
    %c0_15 = arith.constant 0 : index
    %c0_16 = arith.constant 0 : index
    %24 = vector.load %arg8[%c0_15, %c0_16] : memref<10x16xbf16, #tpu.memory_space<vmem>>, vector<10x16xbf16>
    %cst_17 = arith.constant dense<0.000000e+00> : vector<8x16xf32>
    %25 = tpu.matmul %23, %24, %cst_17 {dimension_numbers = #tpu.dot_dimension_numbers<[1], [0], [0], [1], [0, 0, 1, 1], [], []>} : vector<8x10xbf16>, vector<10x16xbf16>, vector<8x16xf32> -> vector<8x16xf32>
    %c0_18 = arith.constant 0 : index
    %c0_19 = arith.constant 0 : index
    %26 = vector.load %arg9[%c0_18, %c0_19] : memref<1x16xf32, #tpu.memory_space<vmem>>, vector<1x16xf32>
    %27 = vector.broadcast %26 : vector<1x16xf32> to vector<8x16xf32>
    %28 = arith.addf %25, %27 : vector<8x16xf32>
    %cst_20 = arith.constant 0.000000e+00 : f32
    %29 = vector.broadcast %cst_20 : f32 to vector<8x16xf32>
    %30 = arith.maximumf %28, %29 : vector<8x16xf32>
    %31 = arith.truncf %30 : vector<8x16xf32> to vector<8x16xbf16>
    %c0_21 = arith.constant 0 : index
    %c0_22 = arith.constant 0 : index
    %32 = vector.load %arg10[%c0_21, %c0_22] : memref<16x4xbf16, #tpu.memory_space<vmem>>, vector<16x4xbf16>
    %cst_23 = arith.constant dense<0.000000e+00> : vector<8x4xf32>
    %33 = tpu.matmul %31, %32, %cst_23 {dimension_numbers = #tpu.dot_dimension_numbers<[1], [0], [0], [1], [0, 0, 1, 1], [], []>} : vector<8x16xbf16>, vector<16x4xbf16>, vector<8x4xf32> -> vector<8x4xf32>
    %c0_24 = arith.constant 0 : index
    %c0_25 = arith.constant 0 : index
    %34 = vector.load %arg11[%c0_24, %c0_25] : memref<1x4xf32, #tpu.memory_space<vmem>>, vector<1x4xf32>
    %35 = vector.broadcast %34 : vector<1x4xf32> to vector<8x4xf32>
    %36 = arith.addf %33, %35 : vector<8x4xf32>
    %37 = vector.extract_strided_slice %36 {offsets = [0, 0], sizes = [8, 2], strides = [1, 1]} : vector<8x4xf32> to vector<8x2xf32>
    %38 = vector.extract_strided_slice %36 {offsets = [0, 2], sizes = [8, 2], strides = [1, 1]} : vector<8x4xf32> to vector<8x2xf32>
    %39 = arith.truncf %2 : vector<8x2xf32> to vector<8x2xbf16>
    %c0_26 = arith.constant 0 : index
    %c0_27 = arith.constant 0 : index
    %40 = vector.load %arg12[%c0_26, %c0_27] : memref<2x16xbf16, #tpu.memory_space<vmem>>, vector<2x16xbf16>
    %cst_28 = arith.constant dense<0.000000e+00> : vector<8x16xf32>
    %41 = tpu.matmul %39, %40, %cst_28 {dimension_numbers = #tpu.dot_dimension_numbers<[1], [0], [0], [1], [0, 0, 1, 1], [], []>} : vector<8x2xbf16>, vector<2x16xbf16>, vector<8x16xf32> -> vector<8x16xf32>
    %c0_29 = arith.constant 0 : index
    %c0_30 = arith.constant 0 : index
    %42 = vector.load %arg13[%c0_29, %c0_30] : memref<1x16xf32, #tpu.memory_space<vmem>>, vector<1x16xf32>
    %43 = vector.broadcast %42 : vector<1x16xf32> to vector<8x16xf32>
    %44 = arith.addf %41, %43 : vector<8x16xf32>
    %cst_31 = arith.constant 0.000000e+00 : f32
    %45 = vector.broadcast %cst_31 : f32 to vector<8x16xf32>
    %46 = arith.maximumf %44, %45 : vector<8x16xf32>
    %47 = arith.truncf %46 : vector<8x16xf32> to vector<8x16xbf16>
    %c0_32 = arith.constant 0 : index
    %c0_33 = arith.constant 0 : index
    %48 = vector.load %arg14[%c0_32, %c0_33] : memref<16x4xbf16, #tpu.memory_space<vmem>>, vector<16x4xbf16>
    %cst_34 = arith.constant dense<0.000000e+00> : vector<8x4xf32>
    %49 = tpu.matmul %47, %48, %cst_34 {dimension_numbers = #tpu.dot_dimension_numbers<[1], [0], [0], [1], [0, 0, 1, 1], [], []>} : vector<8x16xbf16>, vector<16x4xbf16>, vector<8x4xf32> -> vector<8x4xf32>
    %c0_35 = arith.constant 0 : index
    %c0_36 = arith.constant 0 : index
    %50 = vector.load %arg15[%c0_35, %c0_36] : memref<1x4xf32, #tpu.memory_space<vmem>>, vector<1x4xf32>
    %51 = vector.broadcast %50 : vector<1x4xf32> to vector<8x4xf32>
    %52 = arith.addf %49, %51 : vector<8x4xf32>
    %53 = vector.extract_strided_slice %52 {offsets = [0, 0], sizes = [8, 2], strides = [1, 1]} : vector<8x4xf32> to vector<8x2xf32>
    %54 = vector.extract_strided_slice %52 {offsets = [0, 2], sizes = [8, 2], strides = [1, 1]} : vector<8x4xf32> to vector<8x2xf32>
    %cst_37 = arith.constant 5.000000e-01 : f32
    %55 = vector.broadcast %cst_37 : f32 to vector<8x2xf32>
    %56 = arith.mulf %55, %38 : vector<8x2xf32>
    %57 = math.exp %56 : vector<8x2xf32>
    %58 = arith.mulf %6, %57 : vector<8x2xf32>
    %59 = arith.addf %37, %58 : vector<8x2xf32>
    %cst_38 = arith.constant 5.000000e-01 : f32
    %60 = vector.broadcast %cst_38 : f32 to vector<8x4xf32>
    %61 = arith.mulf %60, %22 : vector<8x4xf32>
    %62 = math.exp %61 : vector<8x4xf32>
    %63 = arith.mulf %5, %62 : vector<8x4xf32>
    %64 = arith.addf %21, %63 : vector<8x4xf32>
    %65 = tpu.concatenate %64, %3, %59 in 1 : vector<8x4xf32>, vector<8x2xf32>, vector<8x2xf32> -> vector<8x8xf32>
    %66 = arith.truncf %65 : vector<8x8xf32> to vector<8x8xbf16>
    %c0_39 = arith.constant 0 : index
    %c0_40 = arith.constant 0 : index
    %67 = vector.load %arg16[%c0_39, %c0_40] : memref<8x16xbf16, #tpu.memory_space<vmem>>, vector<8x16xbf16>
    %cst_41 = arith.constant dense<0.000000e+00> : vector<8x16xf32>
    %68 = tpu.matmul %66, %67, %cst_41 {dimension_numbers = #tpu.dot_dimension_numbers<[1], [0], [0], [1], [0, 0, 1, 1], [], []>} : vector<8x8xbf16>, vector<8x16xbf16>, vector<8x16xf32> -> vector<8x16xf32>
    %c0_42 = arith.constant 0 : index
    %c0_43 = arith.constant 0 : index
    %69 = vector.load %arg17[%c0_42, %c0_43] : memref<1x16xf32, #tpu.memory_space<vmem>>, vector<1x16xf32>
    %70 = vector.broadcast %69 : vector<1x16xf32> to vector<8x16xf32>
    %71 = arith.addf %68, %70 : vector<8x16xf32>
    %cst_44 = arith.constant 0.000000e+00 : f32
    %72 = vector.broadcast %cst_44 : f32 to vector<8x16xf32>
    %73 = arith.maximumf %71, %72 : vector<8x16xf32>
    %74 = arith.truncf %73 : vector<8x16xf32> to vector<8x16xbf16>
    %c0_45 = arith.constant 0 : index
    %c0_46 = arith.constant 0 : index
    %75 = vector.load %arg18[%c0_45, %c0_46] : memref<16x16xbf16, #tpu.memory_space<vmem>>, vector<16x16xbf16>
    %cst_47 = arith.constant dense<0.000000e+00> : vector<8x16xf32>
    %76 = tpu.matmul %74, %75, %cst_47 {dimension_numbers = #tpu.dot_dimension_numbers<[1], [0], [0], [1], [0, 0, 1, 1], [], []>} : vector<8x16xbf16>, vector<16x16xbf16>, vector<8x16xf32> -> vector<8x16xf32>
    %c0_48 = arith.constant 0 : index
    %c0_49 = arith.constant 0 : index
    %77 = vector.load %arg19[%c0_48, %c0_49] : memref<1x16xf32, #tpu.memory_space<vmem>>, vector<1x16xf32>
    %78 = vector.broadcast %77 : vector<1x16xf32> to vector<8x16xf32>
    %79 = arith.addf %76, %78 : vector<8x16xf32>
    %80 = vector.extract_strided_slice %79 {offsets = [0, 0], sizes = [8, 8], strides = [1, 1]} : vector<8x16xf32> to vector<8x8xf32>
    %81 = vector.extract_strided_slice %79 {offsets = [0, 8], sizes = [8, 8], strides = [1, 1]} : vector<8x16xf32> to vector<8x8xf32>
    %82 = vector.extract_strided_slice %65 {offsets = [0, 0], sizes = [8, 6], strides = [1, 1]} : vector<8x8xf32> to vector<8x6xf32>
    %83 = arith.truncf %82 : vector<8x6xf32> to vector<8x6xbf16>
    %c0_50 = arith.constant 0 : index
    %c0_51 = arith.constant 0 : index
    %84 = vector.load %arg20[%c0_50, %c0_51] : memref<6x16xbf16, #tpu.memory_space<vmem>>, vector<6x16xbf16>
    %cst_52 = arith.constant dense<0.000000e+00> : vector<8x16xf32>
    %85 = tpu.matmul %83, %84, %cst_52 {dimension_numbers = #tpu.dot_dimension_numbers<[1], [0], [0], [1], [0, 0, 1, 1], [], []>} : vector<8x6xbf16>, vector<6x16xbf16>, vector<8x16xf32> -> vector<8x16xf32>
    %c0_53 = arith.constant 0 : index
    %c0_54 = arith.constant 0 : index
    %86 = vector.load %arg21[%c0_53, %c0_54] : memref<1x16xf32, #tpu.memory_space<vmem>>, vector<1x16xf32>
    %87 = vector.broadcast %86 : vector<1x16xf32> to vector<8x16xf32>
    %88 = arith.addf %85, %87 : vector<8x16xf32>
    %cst_55 = arith.constant 0.000000e+00 : f32
    %89 = vector.broadcast %cst_55 : f32 to vector<8x16xf32>
    %90 = arith.maximumf %88, %89 : vector<8x16xf32>
    %91 = arith.truncf %90 : vector<8x16xf32> to vector<8x16xbf16>
    %c0_56 = arith.constant 0 : index
    %c0_57 = arith.constant 0 : index
    %92 = vector.load %arg22[%c0_56, %c0_57] : memref<16x2xbf16, #tpu.memory_space<vmem>>, vector<16x2xbf16>
    %cst_58 = arith.constant dense<0.000000e+00> : vector<8x2xf32>
    %93 = tpu.matmul %91, %92, %cst_58 {dimension_numbers = #tpu.dot_dimension_numbers<[1], [0], [0], [1], [0, 0, 1, 1], [], []>} : vector<8x16xbf16>, vector<16x2xbf16>, vector<8x2xf32> -> vector<8x2xf32>
    %c0_59 = arith.constant 0 : index
    %c0_60 = arith.constant 0 : index
    %94 = vector.load %arg23[%c0_59, %c0_60] : memref<1x2xf32, #tpu.memory_space<vmem>>, vector<1x2xf32>
    %95 = vector.broadcast %94 : vector<1x2xf32> to vector<8x2xf32>
    %96 = arith.addf %93, %95 : vector<8x2xf32>
    %cst_61 = arith.constant 0.000000e+00 : f32
    %97 = vector.broadcast %cst_61 : f32 to vector<8x2xf32>
    %98 = arith.subf %97, %96 : vector<8x2xf32>
    %99 = math.exp %98 : vector<8x2xf32>
    %cst_62 = arith.constant 1.000000e+00 : f32
    %100 = vector.broadcast %cst_62 : f32 to vector<8x2xf32>
    %101 = arith.addf %100, %99 : vector<8x2xf32>
    %102 = tpu.reciprocal %101 {approx = true} : vector<8x2xf32> -> vector<8x2xf32>
    %103 = tpu.concatenate %80, %81, %65, %102, %37, %38, %53, %54, %21, %22 in 1 : vector<8x8xf32>, vector<8x8xf32>, vector<8x8xf32>, vector<8x2xf32>, vector<8x2xf32>, vector<8x2xf32>, vector<8x2xf32>, vector<8x2xf32>, vector<8x4xf32>, vector<8x4xf32> -> vector<8x42xf32>
    %c0_63 = arith.constant 0 : index
    %c0_64 = arith.constant 0 : index
    %104 = vector.load %arg24[%c0_63, %c0_64] : memref<8x42xf32, #tpu.memory_space<vmem>>, vector<8x42xf32>
    tpu.vector_store %arg24[%c0_63, %c0_64], %103 {strides = array<i32>} : memref<8x42xf32, #tpu.memory_space<vmem>>, vector<8x42xf32>,
    return
  }
  func.func @transform_0(%arg0: i32) -> (i32, i32) {
    %c0_i32 = arith.constant 0 : i32
    %c0_i32_0 = arith.constant 0 : i32
    return %arg0, %c0_i32 : i32, i32
  }
  func.func @transform_1(%arg0: i32) -> (i32, i32) {
    %c0_i32 = arith.constant 0 : i32
    %c0_i32_0 = arith.constant 0 : i32
    return %arg0, %c0_i32 : i32, i32
  }
  func.func @transform_2(%arg0: i32) -> (i32, i32) {
    %c0_i32 = arith.constant 0 : i32
    %c0_i32_0 = arith.constant 0 : i32
    return %arg0, %c0_i32 : i32, i32
  }
  func.func @transform_3(%arg0: i32) -> (i32, i32) {
    %c0_i32 = arith.constant 0 : i32
    %c0_i32_0 = arith.constant 0 : i32
    %c0_i32_1 = arith.constant 0 : i32
    return %c0_i32, %c0_i32_0 : i32, i32
  }
  func.func @transform_4(%arg0: i32) -> (i32, i32) {
    %c0_i32 = arith.constant 0 : i32
    %c0_i32_0 = arith.constant 0 : i32
    %c0_i32_1 = arith.constant 0 : i32
    return %c0_i32, %c0_i32_0 : i32, i32
  }
  func.func @transform_5(%arg0: i32) -> (i32, i32) {
    %c0_i32 = arith.constant 0 : i32
    %c0_i32_0 = arith.constant 0 : i32
    %c0_i32_1 = arith.constant 0 : i32
    return %c0_i32, %c0_i32_0 : i32, i32
  }
  func.func @transform_6(%arg0: i32) -> (i32, i32) {
    %c0_i32 = arith.constant 0 : i32
    %c0_i32_0 = arith.constant 0 : i32
    %c0_i32_1 = arith.constant 0 : i32
    return %c0_i32, %c0_i32_0 : i32, i32
  }
  func.func @transform_7(%arg0: i32) -> (i32, i32) {
    %c0_i32 = arith.constant 0 : i32
    %c0_i32_0 = arith.constant 0 : i32
    %c0_i32_1 = arith.constant 0 : i32
    return %c0_i32, %c0_i32_0 : i32, i32
  }
  func.func @transform_8(%arg0: i32) -> (i32, i32) {
    %c0_i32 = arith.constant 0 : i32
    %c0_i32_0 = arith.constant 0 : i32
    %c0_i32_1 = arith.constant 0 : i32
    return %c0_i32, %c0_i32_0 : i32, i32
  }
  func.func @transform_9(%arg0: i32) -> (i32, i32) {
    %c0_i32 = arith.constant 0 : i32
    %c0_i32_0 = arith.constant 0 : i32
    %c0_i32_1 = arith.constant 0 : i32
    return %c0_i32, %c0_i32_0 : i32, i32
  }
  func.func @transform_10(%arg0: i32) -> (i32, i32) {
    %c0_i32 = arith.constant 0 : i32
    %c0_i32_0 = arith.constant 0 : i32
    %c0_i32_1 = arith.constant 0 : i32
    return %c0_i32, %c0_i32_0 : i32, i32
  }
  func.func @transform_11(%arg0: i32) -> (i32, i32) {
    %c0_i32 = arith.constant 0 : i32
    %c0_i32_0 = arith.constant 0 : i32
    %c0_i32_1 = arith.constant 0 : i32
    return %c0_i32, %c0_i32_0 : i32, i32
  }
  func.func @transform_12(%arg0: i32) -> (i32, i32) {
    %c0_i32 = arith.constant 0 : i32
    %c0_i32_0 = arith.constant 0 : i32
    %c0_i32_1 = arith.constant 0 : i32
    return %c0_i32, %c0_i32_0 : i32, i32
  }
  func.func @transform_13(%arg0: i32) -> (i32, i32) {
    %c0_i32 = arith.constant 0 : i32
    %c0_i32_0 = arith.constant 0 : i32
    %c0_i32_1 = arith.constant 0 : i32
    return %c0_i32, %c0_i32_0 : i32, i32
  }
  func.func @transform_14(%arg0: i32) -> (i32, i32) {
    %c0_i32 = arith.constant 0 : i32
    %c0_i32_0 = arith.constant 0 : i32
    %c0_i32_1 = arith.constant 0 : i32
    return %c0_i32, %c0_i32_0 : i32, i32
  }
  func.func @transform_15(%arg0: i32) -> (i32, i32) {
    %c0_i32 = arith.constant 0 : i32
    %c0_i32_0 = arith.constant 0 : i32
    %c0_i32_1 = arith.constant 0 : i32
    return %c0_i32, %c0_i32_0 : i32, i32
  }
  func.func @transform_16(%arg0: i32) -> (i32, i32) {
    %c0_i32 = arith.constant 0 : i32
    %c0_i32_0 = arith.constant 0 : i32
    %c0_i32_1 = arith.constant 0 : i32
    return %c0_i32, %c0_i32_0 : i32, i32
  }
  func.func @transform_17(%arg0: i32) -> (i32, i32) {
    %c0_i32 = arith.constant 0 : i32
    %c0_i32_0 = arith.constant 0 : i32
    %c0_i32_1 = arith.constant 0 : i32
    return %c0_i32, %c0_i32_0 : i32, i32
  }
  func.func @transform_18(%arg0: i32) -> (i32, i32) {
    %c0_i32 = arith.constant 0 : i32
    %c0_i32_0 = arith.constant 0 : i32
    %c0_i32_1 = arith.constant 0 : i32
    return %c0_i32, %c0_i32_0 : i32, i32
  }
  func.func @transform_19(%arg0: i32) -> (i32, i32) {
    %c0_i32 = arith.constant 0 : i32
    %c0_i32_0 = arith.constant 0 : i32
    %c0_i32_1 = arith.constant 0 : i32
    return %c0_i32, %c0_i32_0 : i32, i32
  }
  func.func @transform_20(%arg0: i32) -> (i32, i32) {
    %c0_i32 = arith.constant 0 : i32
    %c0_i32_0 = arith.constant 0 : i32
    %c0_i32_1 = arith.constant 0 : i32
    return %c0_i32, %c0_i32_0 : i32, i32
  }
  func.func @transform_21(%arg0: i32) -> (i32, i32) {
    %c0_i32 = arith.constant 0 : i32
    %c0_i32_0 = arith.constant 0 : i32
    %c0_i32_1 = arith.constant 0 : i32
    return %c0_i32, %c0_i32_0 : i32, i32
  }
  func.func @transform_22(%arg0: i32) -> (i32, i32) {
    %c0_i32 = arith.constant 0 : i32
    %c0_i32_0 = arith.constant 0 : i32
    %c0_i32_1 = arith.constant 0 : i32
    return %c0_i32, %c0_i32_0 : i32, i32
  }
  func.func @transform_23(%arg0: i32) -> (i32, i32) {
    %c0_i32 = arith.constant 0 : i32
    %c0_i32_0 = arith.constant 0 : i32
    return %arg0, %c0_i32 : i32, i32
  }
}

</mosaic_0001>

<bundles_post_ra>
// kernel: tpu_custom_call.1
= control target key start
LH: loop header
LB: loop body
LE: loop exit
PB: predicated region body
PF: predicated region fallthrough
CT: control target
= control target key end

     0   :  { %s1179_s0 = inlined_call_operand.vmem [shape: f32[8,10], index: 0, kind: input, shape index: {}]   ;;  %s1180_s1 = inlined_call_operand.vmem [shape: f32[8,2], index: 1, kind: input, shape index: {}]   ;;  %s1181_s2 = inlined_call_operand.vmem [shape: f32[8,6], index: 2, kind: input, shape index: {}]   ;;  %s1182_s3 = inlined_call_operand.vmem [shape: bf16[8,16], index: 3, kind: input, shape index: {}]   ;;  %s1183_s4 = inlined_call_operand.vmem [shape: f32[1,16], index: 4, kind: input, shape index: {}]   ;;  %s1184_s5 = inlined_call_operand.vmem [shape: bf16[16,8], index: 5, kind: input, shape index: {}]   ;;  %s1185_s6 = inlined_call_operand.vmem [shape: f32[1,8], index: 6, kind: input, shape index: {}]   ;;  %s1186_s7 = inlined_call_operand.vmem [shape: bf16[10,16], index: 7, kind: input, shape index: {}]   ;;  %s1187_s8 = inlined_call_operand.vmem [shape: f32[1,16], index: 8, kind: input, shape index: {}]   ;;  %s1188_s9 = inlined_call_operand.vmem [shape: bf16[16,4], index: 9, kind: input, shape index: {}]   ;;  %s1189_s10 = inlined_call_operand.vmem [shape: f32[1,4], index: 10, kind: input, shape index: {}]   ;;  %s1190_s11 = inlined_call_operand.vmem [shape: bf16[2,16], index: 11, kind: input, shape index: {}]   ;;  %s1191_s12 = inlined_call_operand.vmem [shape: f32[1,16], index: 12, kind: input, shape index: {}]   ;;  %s1192_s13 = inlined_call_operand.vmem [shape: bf16[16,4], index: 13, kind: input, shape index: {}]   ;;  %s1193_s14 = inlined_call_operand.vmem [shape: f32[1,4], index: 14, kind: input, shape index: {}]   ;;  %s1194_s15 = inlined_call_operand.vmem [shape: bf16[8,16], index: 15, kind: input, shape index: {}]   ;;  %s1195_s16 = inlined_call_operand.vmem [shape: f32[1,16], index: 16, kind: input, shape index: {}]   ;;  %s1196_s17 = inlined_call_operand.vmem [shape: bf16[16,16], index: 17, kind: input, shape index: {}]   ;;  %s1197_s18 = inlined_call_operand.vmem [shape: f32[1,16], index: 18, kind: input, shape index: {}]   ;;  %s1198_s19 = inlined_call_operand.vmem [shape: bf16[6,16], index: 19, kind: input, shape index: {}]   ;;  %s1199_s20 = inlined_call_operand.vmem [shape: f32[1,16], index: 20, kind: input, shape index: {}]   ;;  %s1200_s21 = inlined_call_operand.vmem [shape: bf16[16,2], index: 21, kind: input, shape index: {}]   ;;  %s1201_s22 = inlined_call_operand.vmem [shape: f32[1,2], index: 22, kind: input, shape index: {}]   ;;  %s1202_s23 = inlined_call_operand.hbm [shape: f32[8,42], index: 23, kind: output, shape index: {}]  }
   0x1   :  { %1203 = sst [smem:[#allocation5_spill]] %s1179_s0 }
   0x2   :  { %1204 = sst [smem:[#allocation6_spill]] %s1180_s1 }
   0x3   :  { %1205 = sst [smem:[#allocation7_spill]] %s1181_s2 }
   0x4   :  { %1206 = sst [smem:[#allocation8_spill]] %s1182_s3 }
   0x5   :  { %1207 = sst [smem:[#allocation9_spill]] %s1183_s4 }
   0x6   :  { %1208 = sst [smem:[#allocation10_spill]] %s1184_s5 }
   0x7   :  { %1209 = sst [smem:[#allocation11_spill]] %s1185_s6 }
   0x8   :  { %1210 = sst [smem:[#allocation12_spill]] %s1186_s7 }
   0x9   :  { %s1211_s24 = sld [smem:[#allocation8_spill]]  ;;  %vm92_vm0 = vcmask 1043456   ;;  %v913_v1 = vmov 0.0   ;;  %s1212_s1 = sld [smem:[#allocation5_spill]]  ;;  %vm88_vm1 = vcmask 64512   ;;  %vm914_vm2 = vmmov 0  }
   0xa   :  { %802 = vmatprep.subr.bf16.mxu0 %v913_v1  ;;  %808 = vmatprep.subr.bf16.mxu1 %v913_v1  ;;  %s1213_s6 = sld [smem:[#allocation12_spill]]  ;;  %vm214_vm3 = vcmask 1044480  }
   0xb   :  { %804 = vmatprep.mubr.msk.bf16.mxu0 %vm914_vm2, %v913_v1  ;;  %810 = vmatprep.mubr.msk.bf16.mxu1 %vm914_vm2, %v913_v1 }
   0xf   :  { %v80_v0 = vld [vmem:[%s1211_s24] sm:$0xf] }
  0x10   :  { %v94_v2 = vsel %vm92_vm0, %v80_v0, 0  ;;  %v76_v3 = vld [vmem:[%s1212_s1] sm:$0xff] }
  0x11   :  { %803 = vmatpush3.bf16.msra.mxu0 %v94_v2  ;;  %v79_v4 = vpack.c.bf16 %v76_v3, %v76_v3  ;;  %v875_v5 = vld [vmem:[%s1213_s6] sm:$0x1f]  }
  0x12   :  { %814 = vmatprep.subr.bf16.mxu0 %v913_v1  ;;  %v216_v6 = vsel %vm214_vm3, %v875_v5, 0 }
  0x14   :  { %805 = vmatmul.mubr.msk.bf16.vlgmr.msra.gmra.mrb[0].mxu0 %vm88_vm1, %v79_v4 }
  0x15   :  { %815 = vmatpush3.bf16.msra.mxu0 %v216_v6  ;;  %816 = vmatprep.mubr.msk.bf16.mxu0 %vm914_vm2, %v913_v1 }
  0x16   :  { %826 = vmatprep.subr.bf16.mxu0 %v913_v1 }
  0x17   :  { %28 = vsyncpa [#allocation3], 0  ;;  %vm211_vm4 = vcmask 80896   ;;  %s1214_s28 = sld [smem:[#allocation10_spill]]  ;;  %s1215_s0 = sld [smem:[#allocation9_spill]]  ;;  %vm153_vm5 = vcmask 130048  }
  0x18   :  { %v877_v15 = vld [vmem:[%s1188_s9] sm:$0xff]   ;;  %s1216_s1 = sld [smem:[#allocation11_spill]]  ;;  %s916_s6 = smov 124   ;;  %vm333_vm6 = vcmask 1040384   ;;  %vm329_vm7 = vcmask 15360   ;;  %vm467_vm8 = vcmask 31744  }
  0x19   :  { %v761_v17 = vld [vmem:[%s1187_s8] ss:$0 sm:$0xff]  ;;  %s915_s8 = smov 120   ;;  %s917_s27 = smov 2   ;;  %vm469_vm9 = vcmask 48128   ;;  %vm596_vm10 = vcmask 1042432  }
  0x1a   :  { %327 = vrot.lane.b32.xlu1 %v79_v4, %s915_s8  ;;  %v764_v33 = vld [vmem:[%s1189_s10] ss:$0 sm:$0xff]  ;;  %s1217_s4 = sld [smem:[#allocation7_spill]]  ;;  %s1218_s30 = sld [smem:[#allocation6_spill]]  ;;  %vm726_vm11 = vcmask 195584   ;;  %vm728_vm12 = vcmask 211968  }
  0x1b   :  { %v472_v43 = vld [vmem:[%s1194_s15] sm:$0xf]  ;;  %s918_s24 = smov 4   ;;  %s919_s25 = smov 6   ;;  %vm730_vm13 = vcmask 228352   ;;  %vm732_vm14 = vcmask 244736  }
  0x1c   :  { %817 = vmatmul.mubr.msk.bf16.vlgmr.msra.gmra.mrb[4].mxu0 %vm211_vm4, %v79_v4  ;;  %v318_v44 = vld [vmem:[%s1190_s11] sm:$0x1]  ;;  %v484_v46 = vsel %vm92_vm0, %v472_v43, 0  ;;  %vm734_vm15 = vcmask 261120   ;;  %vm736_vm0 = vcmask 277504  }
  0x1d   :  { %828 = vmatprep.mubr.msk.bf16.mxu0 %vm914_vm2, %v913_v1  ;;  %v876_v7 = vld [vmem:[%s1214_s28] sm:$0xff]   ;;  %v335_v45 = vsel %vm333_vm6, %v318_v44, 0 }
  0x1e   :  { %809 = vmatpush3.bf16.msra.mxu1 %v876_v7  ;;  %v756_v8 = vld [vmem:[%s1215_s0] ss:$0 sm:$0xff]  ;;  %827 = vmatpush3.bf16.msra.mxu0 %v335_v45 }
  0x1f   :  { %820 = vmatprep.subr.bf16.mxu1 %v913_v1  ;;  %v758_v25 = vld [vmem:[%s1216_s1] ss:$0 sm:$0xff]  ;;  %838 = vmatprep.subr.bf16.mxu0 %v913_v1 }
  0x20   :  { %v78_v48 = vld [vmem:[%s1217_s4] sm:$0xff]  ;;  %s923_s4 = smov 24  }
  0x21   :  { %v77_v51 = vld [vmem:[%s1218_s30] sm:$0xff] }
  0x22   :  { %v767_v56 = vld [vmem:[%s1191_s12] ss:$0 sm:$0xff]  ;;  %s920_s12 = smov 16  }
  0x23   :  { %v878_v58 = vld [vmem:[%s1192_s13] sm:$0xff]   ;;  %s921_s13 = smov 26  }
  0x24   :  { %v586_v0 = vld [vmem:[%s1198_s19] sm:$0x7]  ;;  %s922_s19 = smov 34  }
  0x8c   :  { %v328_v47 = vpop.permute.xlu1 %327 }
  0x8d   :  { %829 = vmatmul.mubr.msk.bf16.vlgmr.msra.gmra.mrb[8].mxu0 %vm329_vm7, %v328_v47 }
  0x8e   :  { %839 = vmatpush3.bf16.msra.mxu0 %v484_v46  ;;  %840 = vmatprep.mubr.msk.bf16.mxu0 %vm914_vm2, %v913_v1  ;;  %v769_v46 = vld [vmem:[%s1193_s14] ss:$0 sm:$0xff]  ;;  %s925_s14 = smov [#allocation2]  }
  0x8f   :  { %850 = vmatprep.subr.bf16.mxu0 %v913_v1  ;;  %s748_s30 = sshll.u32 %s925_s14, 4  ;;  %s749_s30 = int_to_ptr.vmem [resolvable:$true] %s748_s30 }
  0x90   :  { %p894_p1 = scmp.lt.s32.totalorder %s749_s30, %s749_s30 }
  0xe7   :  { %v130_v9 = vpop.f32.mrb[0].mxu0 }
  0xe8   :  { %v131_v10 = vadd.f32 %v756_v8, %v130_v9  ;;  %v806_v11 = vpop.f32.mrb[1].mxu0  ;;  %v598_v9 = vsel %vm596_vm10, %v586_v0, 0 }
  0xe9   :  { %v133_v12 = vpop.f32.mrb[2].mxu0  ;;  %v772_v11 = vld [vmem:[%s1195_s16] ss:$0 sm:$0xff] }
  0xea   :  { %v136_v13 = vmax.f32 %v131_v10, 0.0  ;;  %v807_v14 = vpop.f32.mrb[3].mxu0  ;;  %v879_v10 = vld [vmem:[%s1196_s17] sm:$0xff]  }
  0xec   :  { %v137_v16 = vpack.c.bf16 %v136_v13, %v136_v13 }
  0xee   :  { %811 = vmatmul.mubr.msk.bf16.vlgmr.msra.gmra.mrb[0].mxu1 %vm153_vm5, %v137_v16 }
  0xef   :  { %v252_v18 = vpop.f32.mrb[4].mxu0  ;;  %821 = vmatpush3.bf16.msra.mxu1 %v877_v15  ;;  %822 = vmatprep.mubr.msk.bf16.mxu1 %vm914_vm2, %v913_v1 }
  0xf0   :  { %v253_v19 = vadd.f32 %v761_v17, %v252_v18  ;;  %v818_v20 = vpop.f32.mrb[5].mxu0  ;;  %832 = vmatprep.subr.bf16.mxu1 %v913_v1 }
  0xf1   :  { %v255_v21 = vpop.f32.mrb[6].mxu0 }
  0xf2   :  { %v258_v22 = vmax.f32 %v253_v19, 0.0  ;;  %v819_v23 = vpop.f32.mrb[7].mxu0 }
  0xf4   :  { %v259_v24 = vpack.c.bf16 %v258_v22, %v258_v22  ;;  %v880_v22 = vld [vmem:[%s1200_s21] sm:$0xff]  }
  0xf6   :  { %823 = vmatmul.mubr.msk.bf16.vlgmr.msra.gmra.mrb[4].mxu1 %vm153_vm5, %v259_v24  ;;  %v777_v24 = vld [vmem:[%s1199_s20] ss:$0 sm:$0xff] }
  0xf7   :  { %834 = vmatprep.mubr.msk.bf16.mxu1 %vm914_vm2, %v913_v1  ;;  %833 = vmatpush3.bf16.msra.mxu1 %v878_v58 }
  0xf8   :  { %844 = vmatprep.subr.bf16.mxu1 %v913_v1 }
 0x160   :  { %v371_v57 = vpop.f32.mrb[8].mxu0 }
 0x161   :  { %v372_v60 = vadd.f32 %v767_v56, %v371_v57  ;;  %v830_v61 = vpop.f32.mrb[9].mxu0 }
 0x162   :  { %v374_v63 = vpop.f32.mrb[10].mxu0 }
 0x163   :  { %v377_v2 = vmax.f32 %v372_v60, 0.0  ;;  %v831_v3 = vpop.f32.mrb[11].mxu0 }
 0x165   :  { %v378_v7 = vpack.c.bf16 %v377_v2, %v377_v2 }
 0x167   :  { %835 = vmatmul.mubr.msk.bf16.vlgmr.msra.gmra.mrb[8].mxu1 %vm153_vm5, %v378_v7 }
 0x168   :  { %846 = vmatprep.mubr.msk.bf16.mxu1 %vm914_vm2, %v913_v1  ;;  %845 = vmatpush3.bf16.msra.mxu1 %v879_v10 }
 0x169   :  { %856 = vmatprep.subr.bf16.mxu1 %v913_v1 }
 0x1c1   :  { %v191_v26 = vpop.f32.mrb[0].mxu1 }
 0x1c2   :  { %v1092_v27 = vadd.f32 %v758_v25, %v191_v26  ;;  %v812_v28 = vpop.f32.mrb[1].mxu1 }
 0x1c3   :  { %v194_v29 = vpop.f32.mrb[2].mxu1 }
 0x1c4   :  { %v450_v30 = vmul.f32 0.5, %v1092_v27  ;;  %v813_v31 = vpop.f32.mrb[3].mxu1 }
 0x1c6   :  { %v451_v32 = vmul.f32 1.442695, %v450_v30 }
 0x1c8   :  { %881 = vpow2.f32 %v451_v32 }
 0x1c9   :  { %v312_v34 = vpop.f32.mrb[4].mxu1 }
 0x1ca   :  { %v1098_v35 = vadd.f32 %v764_v33, %v312_v34  ;;  %v824_v36 = vpop.f32.mrb[5].mxu1 }
 0x1cb   :  { %v315_v37 = vpop.f32.mrb[6].mxu1  ;;  %v779_v36 = vld [vmem:[%s1201_s22] ss:$0 sm:$0xff]  ;;  %s924_s22 = smov 30  }
 0x1cc   :  { %v437_v38 = vmul.f32 0.5, %v1098_v35  ;;  %v825_v39 = vpop.f32.mrb[7].mxu1 }
 0x1ce   :  { %v438_v40 = vmul.f32 1.442695, %v437_v38 }
 0x1d0   :  { %883 = vpow2.f32 %v438_v40 }
 0x1d2   :  { %v882_v41 = vpop.eup %881 }
 0x1d3   :  { %454 = vrot.lane.b32.xlu1 %v882_v41, %s916_s6 }
 0x1da   :  { %v884_v42 = vpop.eup %883 }
 0x1db   :  { %441 = vrot.lane.b32.xlu0 %v884_v42, %s917_s27 }
 0x23a   :  { %v431_v12 = vpop.f32.mrb[8].mxu1 }
 0x23b   :  { %v836_v14 = vpop.f32.mrb[9].mxu1  ;;  %v432_v47 = vadd.f32 %v769_v46, %v431_v12 }
 0x23c   :  { %v434_v17 = vpop.f32.mrb[10].mxu1 }
 0x23d   :  { %v837_v19 = vpop.f32.mrb[11].mxu1 }
 0x245   :  { %v455_v54 = vpop.permute.xlu1 %454 }
 0x246   :  { %v457_v55 = vmul.f32 %v455_v54, %v78_v48 }
 0x248   :  { %v458_v62 = vadd.f32 %v457_v55, %v1092_v27 }
 0x24d   :  { %v442_v49 = vpop.permute.xlu0 %441 }
 0x24e   :  { %v444_v50 = vmul.f32 %v442_v49, %v78_v48  ;;  %v774_v48 = vld [vmem:[%s1197_s18] ss:$0 sm:$0xff]  ;;  %s889_s18 = scalar_lea.vmem %s749_s30, 128 }
 0x24f   :  { %p890_p0 = scmp.ne.s32.totalorder %s749_s30, %s889_s18  ;;  %p895_p2 = scmp.lt.s32.totalorder %s889_s18, %s889_s18 }
 0x250   :  { %446 = vrot.lane.b32.xlu0 %v444_v50, %s916_s6 }
 0x251   :  { %p896_p3 = por %p895_p2, %p894_p1 }
 0x253   :  { %p897_p4 = pnand %p896_p3, %p890_p0 }
 0x254   :  { %460 = vrot.lane.b32.xlu0 %v77_v51, %s918_s24 }
 0x2c2   :  { %v447_v52 = vpop.permute.xlu0 %446 }
 0x2c3   :  { %v449_v53 = vadd.f32 %v447_v52, %v1098_v35 }
 0x2c5   :  { %464 = vrot.lane.b32.xlu1 %v449_v53, %s919_s25 }
 0x2c6   :  { %v461_v59 = vpop.permute.xlu0 %460 }
 0x2c7   :  { %v468_v4 = vsel %vm467_vm8, %v458_v62, %v461_v59 }
 0x337   :  { %v465_v5 = vpop.permute.xlu1 %464 }
 0x338   :  { %v470_v6 = vsel %vm469_vm9, %v468_v4, %v465_v5 }
 0x339   :  { %706 = vrot.lane.b32.xlu0 %v470_v6, %s920_s12  ;;  %v471_v8 = vpack.c.bf16 %v470_v6, %v470_v6 }
 0x33b   :  { %841 = vmatmul.mubr.msk.bf16.vlgmr.msra.gmra.mrb[12].mxu0 %vm88_vm1, %v471_v8  ;;  %vm738_vm1 = vcmask 310272  }
 0x33c   :  { %851 = vmatpush3.bf16.msra.mxu0 %v598_v9  ;;  %852 = vmatprep.mubr.msk.bf16.mxu0 %vm914_vm2, %v913_v1 }
 0x33d   :  { %714 = vrot.lane.b32.xlu0 %v1098_v35, %s921_s13 }
 0x341   :  { %722 = vrot.lane.b32.xlu0 %v1092_v27, %s922_s19 }
 0x343   :  { %853 = vmatmul.mubr.msk.bf16.vlgmr.msra.gmra.mrb[16].mxu0 %vm469_vm9, %v471_v8 }
 0x3ab   :  { %v707_v49 = vpop.permute.xlu0 %706 }
 0x3af   :  { %v715_v51 = vpop.permute.xlu0 %714 }
 0x3b3   :  { %v723_v59 = vpop.permute.xlu0 %722 }
 0x40e   :  { %v520_v13 = vpop.f32.mrb[12].mxu0 }
 0x40f   :  { %v521_v15 = vadd.f32 %v772_v11, %v520_v13  ;;  %v842_v16 = vpop.f32.mrb[13].mxu0 }
 0x410   :  { %v523_v18 = vpop.f32.mrb[14].mxu0 }
 0x411   :  { %v526_v20 = vmax.f32 %v521_v15, 0.0  ;;  %v843_v21 = vpop.f32.mrb[15].mxu0 }
 0x413   :  { %v527_v23 = vpack.c.bf16 %v526_v20, %v526_v20 }
 0x415   :  { %847 = vmatmul.mubr.msk.bf16.vlgmr.msra.gmra.mrb[12].mxu1 %vm153_vm5, %v527_v23 }
 0x416   :  { %v634_v25 = vpop.f32.mrb[16].mxu0  ;;  %857 = vmatpush3.bf16.msra.mxu1 %v880_v22  ;;  %858 = vmatprep.mubr.msk.bf16.mxu1 %vm914_vm2, %v913_v1  ;;  %vm740_vm2 = vcmask 343040  }
 0x417   :  { %v635_v26 = vadd.f32 %v777_v24, %v634_v25  ;;  %v854_v27 = vpop.f32.mrb[17].mxu0 }
 0x418   :  { %v637_v28 = vpop.f32.mrb[18].mxu0 }
 0x419   :  { %v640_v29 = vmax.f32 %v635_v26, 0.0  ;;  %v855_v30 = vpop.f32.mrb[19].mxu0 }
 0x41b   :  { %v641_v31 = vpack.c.bf16 %v640_v29, %v640_v29 }
 0x41d   :  { %859 = vmatmul.mubr.msk.bf16.vlgmr.msra.gmra.mrb[16].mxu1 %vm153_vm5, %v641_v31 }
 0x4e8   :  { %v580_v32 = vpop.f32.mrb[12].mxu1 }
 0x4e9   :  { %v848_v33 = vpop.f32.mrb[13].mxu1  ;;  %v581_v50 = vadd.f32 %v774_v48, %v580_v32 }
 0x4ea   :  { %v583_v34 = vpop.f32.mrb[14].mxu1 }
 0x4eb   :  { %v849_v35 = vpop.f32.mrb[15].mxu1  ;;  %v725_v52 = vsel %vm153_vm5, %v581_v50, %v707_v49 }
 0x4f0   :  { %v694_v37 = vpop.f32.mrb[16].mxu1 }
 0x4f1   :  { %v695_v38 = vadd.f32 %v779_v36, %v694_v37  ;;  %v860_v39 = vpop.f32.mrb[17].mxu1 }
 0x4f2   :  { %v697_v1 = vpop.f32.mrb[18].mxu1 }
 0x4f3   :  { %v700_v40 = vsub.f32 0.0, %v695_v38  ;;  %v861_v41 = vpop.f32.mrb[19].mxu1 }
 0x4f5   :  { %v701_v42 = vmul.f32 1.442695, %v700_v40 }
 0x4f7   :  { %885 = vpow2.f32 %v701_v42 }
 0x501   :  { %v886_v43 = vpop.eup %885 }
 0x502   :  { %v703_v44 = vadd.f32 1.0, %v886_v43 }
 0x504   :  { %887 = vrcp.f32 %v703_v44 }
 0x50e   :  { %v888_v45 = vpop.eup %887 }
 0x50f   :  { %710 = vrot.lane.b32.xlu1 %v888_v45, %s923_s4 }
 0x513   :  { %718 = vrot.lane.b32.xlu1 %v432_v47, %s924_s22 }
 0x581   :  { %v711_v53 = vpop.permute.xlu1 %710 }
 0x582   :  { %v727_v54 = vsel %vm726_vm11, %v725_v52, %v711_v53 }
 0x583   :  { %v729_v55 = vsel %vm728_vm12, %v727_v54, %v715_v51 }
 0x584   :  { %v731_v56 = vsel %vm730_vm13, %v729_v55, %v715_v51 }
 0x585   :  { %v719_v57 = vpop.permute.xlu1 %718 }
 0x586   :  { %v733_v58 = vsel %vm732_vm14, %v731_v56, %v719_v57 }
 0x587   :  { %v735_v60 = vsel %vm734_vm15, %v733_v58, %v719_v57 }
 0x588   :  { %v737_v61 = vsel %vm736_vm0, %v735_v60, %v723_v59 }
 0x589   :  { %v739_v62 = vsel %vm738_vm1, %v737_v61, %v723_v59 }
 0x58a   :  { %741 = vst.msk [vmem:[#allocation2] sm:$0xff] %vm740_vm2, %v739_v62 }
 0x58b   :  { %900 = shalt.err (!%p897_p4)
}
 0x58c   :  { %s901_s8 = scalar_lea.hbm %s1202_s23, 128 }
 0x58d   :  { %p902_p5 = scmp.ne.s32.totalorder %s1202_s23, %s901_s8  ;;  %p905_p6 = scmp.lt.u32.totalorder %s901_s8, %s1202_s23 }
 0x58f   :  { %p907_p7 = pnand %p905_p6, %p902_p5 }
 0x591   :  { %910 = shalt.err (!%p907_p7)
}
 0x592   :  { %751 = dma.vmem_to_hbm [thread:$0]  %s749_s30, 128, %s1202_s23, [#allocation3]  }
 0x593   :  { %911 = dma.done.wait [#allocation3], 128  }
 0x594   :  { %912 = vsyncadd [#allocation3], 4294967168 }
 0x595   :  { %755 = vsyncpa [#allocation3], 1 }

</bundles_post_ra>
